<compile_context>
chip_gen: v7x
topology: tpu7x:2x2x1
jax: 0.10.0
libtpu: 0.0.40
codegen_flags: <defaults>
</compile_context>

<pallas_src>
import jax
import jax.numpy as jnp
from jax.experimental import pallas as pl
from jax.experimental.pallas import tpu as pltpu


# ---------------------------------------------------------------------------
# Constant sinusoid table (same math as the PyTorch module's buffer).
# ---------------------------------------------------------------------------
def make_sinusoid_table(n_position: int, d_hid: int, dtype=jnp.float32):
    pos = jnp.arange(n_position, dtype=jnp.float32)[:, None]          # (P, 1)
    hid = jnp.arange(d_hid, dtype=jnp.float32)[None, :]               # (1, D)
    # angle[p, j] = p / 10000^(2*(j//2)/d_hid)
    angles = pos / jnp.power(10000.0, 2.0 * jnp.floor(hid / 2.0) / d_hid)
    even = (jnp.arange(d_hid) % 2 == 0)[None, :]
    table = jnp.where(even, jnp.sin(angles), jnp.cos(angles))
    return table.astype(dtype)                                         # (P, D)


# ---------------------------------------------------------------------------
# Kernel: fused add of one (ts, D) PE tile onto one (tb, ts, D) tile of x.
# Pure vld/vadd/vst; PE broadcasts over the folded batch dim.
# ---------------------------------------------------------------------------
def _pe_add_kernel(x_ref, pe_ref, o_ref):
    o_ref[...] = x_ref[...] + pe_ref[...]


# ---------------------------------------------------------------------------
# Tile picking: ~block_budget bytes per block, ts multiple of 8 (or == S),
# batch folded into the block (tb divides B). D always kept whole.
# ---------------------------------------------------------------------------
def _pick_tiles(B, S, D, itemsize, block_budget_bytes=4 << 20):
    row_bytes = max(1, D * itemsize)
    max_rows = max(1, block_budget_bytes // row_bytes)
    if S <= max_rows:
        ts = S                                   # full seq fits: ts == S is always legal
    else:
        ts = 0
        cap = max(8, (max_rows // 8) * 8)
        for cand in range(cap, 7, -8):           # prefer an exact divisor of S
            if S % cand == 0:
                ts = cand
                break
        if ts == 0:
            ts = cap                             # ragged last tile via pl.cdiv grid
    # Fold batch into the block up to the budget; keep tb an exact divisor of B.
    tb = max(1, min(B, block_budget_bytes // max(1, ts * row_bytes)))
    while B % tb != 0:
        tb -= 1
    return tb, ts


# ---------------------------------------------------------------------------
# Wrapper: pallas_call with a (seq_tiles, batch_tiles) parallel grid.
# PE block index is constant across the inner (batch) axis -> DMA'd once per
# seq tile, not once per batch element.
# ---------------------------------------------------------------------------
def positional_encoding_pallas(x, pos_table):
    """x: (B, S, D); pos_table: (n_position, D) with n_position >= S."""
    B, S, D = x.shape
    assert pos_table.shape[0] >= S and pos_table.shape[1] == D

    pe = pos_table[:S, :].astype(x.dtype)        # (S, D): slice + cast in the wrapper
    itemsize = jnp.dtype(x.dtype).itemsize
    tb, ts = _pick_tiles(B, S, D, itemsize)

    n_s = pl.cdiv(S, ts)
    n_b = B // tb
    grid = (n_s, n_b)                            # seq-tiles leading, batch innermost

    x_block_bytes = tb * ts * D * itemsize
    pe_block_bytes = ts * D * itemsize
    # x + out double-buffered, pe double-buffered, plus margin.
    footprint = 2 * (2 * x_block_bytes + pe_block_bytes) + (8 << 20)
    vmem_limit = int(min(48 << 20, max(32 << 20, footprint)))

    return pl.pallas_call(
        _pe_add_kernel,
        out_shape=jax.ShapeDtypeStruct((B, S, D), x.dtype),
        grid_spec=pltpu.PrefetchScalarGridSpec(
            num_scalar_prefetch=0,
            grid=grid,
            in_specs=[
                pl.BlockSpec((tb, ts, D), lambda s, b: (b, s, 0)),  # x tile
                pl.BlockSpec((ts, D), lambda s, b: (s, 0)),         # pe tile (reused across batch)
            ],
            out_specs=pl.BlockSpec((tb, ts, D), lambda s, b: (b, s, 0)),
        ),
        compiler_params=pltpu.CompilerParams(
            dimension_semantics=("parallel", "parallel"),
            vmem_limit_bytes=vmem_limit,
        ),
    )(x, pe)


if __name__ == "__main__":
    key = jax.random.PRNGKey(0)
    # Small shapes consistent with the module's forward: x is (batch, seq, d_hid).
    B, S, D = 2, 16, 128          # D=128 keeps the last dim lane-dense
    n_position = 256              # module default

    x = jax.random.normal(key, (B, S, D), dtype=jnp.float32)
    pos_table = make_sinusoid_table(n_position, D, dtype=jnp.float32)

    out = positional_encoding_pallas(x, pos_table)
    out = jax.block_until_ready(out)

    # Reference (same semantics as: x + pos_table[:, :x.size(1)])
    ref = x + pos_table[None, :S, :]
    assert out.shape == (B, S, D), out.shape
    assert out.dtype == x.dtype
    assert bool(jnp.allclose(out, ref, rtol=1e-6, atol=1e-6))

    print("KERNEL_OK")
</pallas_src>

<mosaic_0001>
module attributes {stable_mosaic.version = 11 : i64} {
  func.func @_pe_add_kernel(%arg0: i32, %arg1: i32, %arg2: memref<2x16x128xf32, #tpu.memory_space<vmem>>, %arg3: memref<16x128xf32, #tpu.memory_space<vmem>>, %arg4: memref<2x16x128xf32, #tpu.memory_space<vmem>>) attributes {dimension_semantics = [#tpu.dimension_semantics<parallel>, #tpu.dimension_semantics<parallel>], iteration_bounds = array<i64: 1, 1>, scalar_prefetch = 0 : i64, scratch_operands = 0 : i64, tpu.core_type = #tpu.core_type<tc>, window_params = [{transform_indices = @transform_0, window_bounds = array<i64: 2, 16, 128>}, {transform_indices = @transform_1, window_bounds = array<i64: 16, 128>}, {transform_indices = @transform_2, window_bounds = array<i64: 2, 16, 128>}]} {
    %c0 = arith.constant 0 : index
    %c0_0 = arith.constant 0 : index
    %c0_1 = arith.constant 0 : index
    %0 = vector.load %arg2[%c0, %c0_0, %c0_1] : memref<2x16x128xf32, #tpu.memory_space<vmem>>, vector<2x16x128xf32>
    %c0_2 = arith.constant 0 : index
    %c0_3 = arith.constant 0 : index
    %1 = vector.load %arg3[%c0_2, %c0_3] : memref<16x128xf32, #tpu.memory_space<vmem>>, vector<16x128xf32>
    %2 = vector.shape_cast %1 : vector<16x128xf32> to vector<1x16x128xf32>
    %3 = vector.broadcast %2 : vector<1x16x128xf32> to vector<2x16x128xf32>
    %4 = arith.addf %0, %3 : vector<2x16x128xf32>
    %c0_4 = arith.constant 0 : index
    %c0_5 = arith.constant 0 : index
    %c0_6 = arith.constant 0 : index
    %5 = vector.load %arg4[%c0_4, %c0_5, %c0_6] : memref<2x16x128xf32, #tpu.memory_space<vmem>>, vector<2x16x128xf32>
    tpu.vector_store %arg4[%c0_4, %c0_5, %c0_6], %4 {strides = array<i32>} : memref<2x16x128xf32, #tpu.memory_space<vmem>>, vector<2x16x128xf32>,
    return
  }
  func.func @transform_0(%arg0: i32, %arg1: i32) -> (i32, i32, i32) {
    %c0_i32 = arith.constant 0 : i32
    %c0_i32_0 = arith.constant 0 : i32
    return %arg1, %arg0, %c0_i32 : i32, i32, i32
  }
  func.func @transform_1(%arg0: i32, %arg1: i32) -> (i32, i32) {
    %c0_i32 = arith.constant 0 : i32
    %c0_i32_0 = arith.constant 0 : i32
    return %arg0, %c0_i32 : i32, i32
  }
  func.func @transform_2(%arg0: i32, %arg1: i32) -> (i32, i32, i32) {
    %c0_i32 = arith.constant 0 : i32
    %c0_i32_0 = arith.constant 0 : i32
    return %arg1, %arg0, %c0_i32 : i32, i32, i32
  }
}

</mosaic_0001>

<bundles_post_ra>
// kernel: tpu_custom_call.1
= control target key start
LH: loop header
LB: loop body
LE: loop exit
PB: predicated region body
PF: predicated region fallthrough
CT: control target
= control target key end

     0   :  { %7 = vsyncpa [#allocation3], 0  ;;  %s214_s0 = inlined_call_operand.hbm [shape: f32[2,16,128], index: 0, kind: input, shape index: {}]   ;;  %s215_s1 = inlined_call_operand.hbm [shape: f32[16,128], index: 1, kind: input, shape index: {}]   ;;  %s216_s2 = inlined_call_operand.hbm [shape: f32[2,16,128], index: 2, kind: output, shape index: {}]  }
   0x1   :  { %8 = vsyncpa [#allocation6], 0 }
   0x2   :  { %9 = vsyncpa [#allocation4], 0  ;;  %s149_s9 = smov [#allocation2]   ;;  %s77_s13 = scalar_lea.hbm %s214_s0, 512 }
   0x3   :  { %s15_s10 = sshll.u32 %s149_s9, 4  ;;  %p78_p0 = scmp.ne.s32.totalorder %s214_s0, %s77_s13  ;;  %s16_s10 = int_to_ptr.vmem [resolvable:$true] %s15_s10 }
   0x4   :  { %p81_p1 = scmp.lt.u32.totalorder %s77_s13, %s214_s0 }
   0x6   :  { %p83_p2 = pnand %p81_p1, %p78_p0 }
   0x8   :  { %86 = shalt.err (!%p83_p2)
}
   0x9   :  { %s87_s18 = scalar_lea.vmem %s16_s10, 512  ;;  %p92_p4 = scmp.lt.s32.totalorder %s16_s10, %s16_s10 }
   0xa   :  { %p88_p3 = scmp.ne.s32.totalorder %s16_s10, %s87_s18  ;;  %p93_p5 = scmp.lt.s32.totalorder %s87_s18, %s87_s18 }
   0xc   :  { %p94_p6 = por %p93_p5, %p92_p4 }
   0xe   :  { %p95_p7 = pnand %p94_p6, %p88_p3 }
  0x10   :  { %98 = shalt.err (!%p95_p7)
}
  0x11   :  { %s150_s19 = smov 128   ;;  %s151_s20 = smov 8  }
  0x12   :  { %21 = dma.hbm_to_vmem [thread:$0]  %s214_s0, 512, %s16_s10, [#allocation3], %s150_s19, %s150_s19, %s151_s20  }
  0x13   :  { %s152_s23 = smov [#allocation5]   ;;  %s99_s27 = scalar_lea.hbm %s215_s1, 256 }
  0x14   :  { %s27_s24 = sshll.u32 %s152_s23, 4  ;;  %p100_p8 = scmp.ne.s32.totalorder %s215_s1, %s99_s27  ;;  %s28_s24 = int_to_ptr.vmem [resolvable:$true] %s27_s24 }
  0x15   :  { %p103_p9 = scmp.lt.u32.totalorder %s99_s27, %s215_s1 }
  0x17   :  { %p105_p10 = pnand %p103_p9, %p100_p8 }
  0x19   :  { %108 = shalt.err (!%p105_p10)
}
  0x1a   :  { %s109_s4 = scalar_lea.vmem %s28_s24, 256  ;;  %p114_p12 = scmp.lt.s32.totalorder %s28_s24, %s28_s24 }
  0x1b   :  { %p110_p11 = scmp.ne.s32.totalorder %s28_s24, %s109_s4  ;;  %p115_p13 = scmp.lt.s32.totalorder %s109_s4, %s109_s4 }
  0x1d   :  { %p116_p0 = por %p115_p13, %p114_p12 }
  0x1f   :  { %p117_p1 = pnand %p116_p0, %p110_p11 }
  0x21   :  { %120 = shalt.err (!%p117_p1)
}
  0x22   :  { %33 = dma.hbm_to_vmem [thread:$0]  %s215_s1, 256, %s28_s24, [#allocation6], %s150_s19, %s150_s19, %s151_s20  }
  0x23   :  { %143 = dma.done.wait [#allocation3], 512  }
  0x24   :  { %144 = vsyncadd [#allocation3], 4294966784 }
  0x25   :  { %145 = dma.done.wait [#allocation6], 256  }
  0x26   :  { %146 = vsyncadd [#allocation6], 4294967040  ;;  %s153_s6 = smov [#allocation7]   ;;  %v40_v0 = vld [vmem:[#allocation2] sm:$0xff]  ;;  %v41_v2 = vld [vmem:[#allocation2 + $0x8] sm:$0xff] }
  0x27   :  { %s59_s7 = sshll.u32 %s153_s6, 4  ;;  %v44_v1 = vld [vmem:[#allocation5] sm:$0xff]  ;;  %v45_v4 = vld [vmem:[#allocation5 + $0x8] sm:$0xff]  ;;  %v42_v5 = vld [vmem:[#allocation2 + $0x10] sm:$0xff]  ;;  %s60_s7 = int_to_ptr.vmem [resolvable:$true] %s59_s7 }
  0x28   :  { %v46_v3 = vadd.f32 %v44_v1, %v40_v0  ;;  %v43_v6 = vld [vmem:[#allocation2 + $0x18] sm:$0xff]  ;;  %v47_v7 = vadd.f32 %v45_v4, %v41_v2  ;;  %v48_v8 = vadd.f32 %v44_v1, %v42_v5  ;;  %s121_s1 = scalar_lea.vmem %s60_s7, 512  ;;  %p126_p3 = scmp.lt.s32.totalorder %s60_s7, %s60_s7 }
  0x29   :  { %v49_v9 = vadd.f32 %v45_v4, %v43_v6  ;;  %p122_p2 = scmp.ne.s32.totalorder %s60_s7, %s121_s1  ;;  %p127_p4 = scmp.lt.s32.totalorder %s121_s1, %s121_s1 }
  0x2a   :  { %50 = vst [vmem:[#allocation7] sm:$0xff] %v46_v3  ;;  %51 = vst [vmem:[#allocation7 + $0x8] sm:$0xff] %v47_v7 }
  0x2b   :  { %52 = vst [vmem:[#allocation7 + $0x10] sm:$0xff] %v48_v8  ;;  %53 = vst [vmem:[#allocation7 + $0x18] sm:$0xff] %v49_v9  ;;  %p128_p5 = por %p127_p4, %p126_p3 }
  0x2d   :  { %p129_p6 = pnand %p128_p5, %p122_p2 }
  0x2f   :  { %132 = shalt.err (!%p129_p6)
}
  0x30   :  { %s133_s10 = scalar_lea.hbm %s216_s2, 512 }
  0x31   :  { %p134_p7 = scmp.ne.s32.totalorder %s216_s2, %s133_s10  ;;  %p137_p8 = scmp.lt.u32.totalorder %s133_s10, %s216_s2 }
  0x33   :  { %p139_p9 = pnand %p137_p8, %p134_p7 }
  0x35   :  { %142 = shalt.err (!%p139_p9)
}
  0x36   :  { %65 = dma.vmem_to_hbm [thread:$0]  %s60_s7, 512, %s216_s2, [#allocation4], %s150_s19, %s150_s19, %s151_s20  }
  0x37   :  { %147 = dma.done.wait [#allocation4], 512  }
  0x38   :  { %148 = vsyncadd [#allocation4], 4294966784 }
  0x39   :  { %69 = vsyncpa [#allocation3], 1 }
  0x3a   :  { %70 = vsyncpa [#allocation6], 1 }
  0x3b   :  { %71 = vsyncpa [#allocation4], 1 }

</bundles_post_ra>
